<compile_context>
chip_gen: v7x
topology: tpu7x:2x2x1
jax: 0.10.0
libtpu: 0.0.40
codegen_flags: <defaults>
</compile_context>

<pallas_src>
import functools

import jax
import jax.numpy as jnp
from jax.experimental import pallas as pl
from jax.experimental.pallas import tpu as pltpu


def _pos_add_kernel(x_ref, p_ref, o_ref):
    # x_ref: (TB, TL)  one batch-tile x lane-tile of the flattened input
    # p_ref: (1,  TL)  positional-encoding tile, sublane-broadcast over batch
    # o_ref: (TB, TL)
    # Cast on the VPU (bf16 x + f32 params is the common mixed case).
    o_ref[...] = x_ref[...] + p_ref[...].astype(x_ref.dtype)


def _choose_tiles(B, L, x_itemsize, p_itemsize,
                  vmem_budget_bytes=16 * 1024 * 1024):
    """Pick (TB, TL) so (x + out + params) * double-buffering fits the budget."""
    TB = B if B <= 256 else 256            # full batch (legal) or 256-row tiles
    per_step = vmem_budget_bytes // 2      # double buffering doubles live VMEM
    denom = 2 * TB * x_itemsize + p_itemsize   # x + out rows + one params row
    TL = per_step // max(denom, 1)
    TL = max(128, (TL // 128) * 128)       # lane-dense: multiple of 128
    if L <= 128:
        TL = L                             # tiny case: take the whole axis
    else:
        TL = min(TL, L)                    # either mult-of-128 or full extent
    return TB, TL


@functools.partial(jax.jit, static_argnames=())
def learnable_pos_encoding(x, params):
    """x: (B, S, H); params: (1, seq_length, H) with seq_length >= S."""
    B, S, H = x.shape
    # Slice to the current sequence length (matches PyTorch `params[:, :S, :]`).
    # No astype here: the cast (if dtypes differ) happens inside the kernel.
    p = params[:, :S, :]

    # Lane-dense flattening of the trailing (S, H) dims (contiguous reshapes:
    # metadata-only, no HBM traffic).
    L = S * H
    x2 = x.reshape(B, L)
    p2 = p.reshape(1, L)

    TB, TL = _choose_tiles(B, L, x.dtype.itemsize, params.dtype.itemsize)
    nB = pl.cdiv(B, TB)
    nT = pl.cdiv(L, TL)

    out2 = pl.pallas_call(
        _pos_add_kernel,
        out_shape=jax.ShapeDtypeStruct((B, L), x.dtype),
        grid_spec=pltpu.PrefetchScalarGridSpec(
            num_scalar_prefetch=0,
            # L-tile outermost, batch innermost -> params block index is
            # constant across the inner batch sweep and is not re-fetched.
            grid=(nT, nB),
            in_specs=[
                pl.BlockSpec((TB, TL), lambda t, b: (b, t)),   # x
                pl.BlockSpec((1, TL), lambda t, b: (0, t)),    # params (broadcast)
            ],
            out_specs=pl.BlockSpec((TB, TL), lambda t, b: (b, t)),
        ),
        compiler_params=pltpu.CompilerParams(
            # Every grid point writes a distinct output block: both axes are
            # parallel (v7x megacore shards them across its 2 TensorCores).
            dimension_semantics=("parallel", "parallel"),
            # ~16 MiB live tile budget; raise the scoped limit above v5e's
            # 16 MiB default, stay well under v7x's 64 MiB physical VMEM.
            vmem_limit_bytes=32 * 1024 * 1024,
        ),
    )(x2, p2)

    return out2.reshape(B, S, H)


if __name__ == "__main__":
    # Small shapes consistent with the module's forward.
    B, S, H = 2, 8, 32
    seq_length = 16         # param table longer than S to exercise the slice

    key = jax.random.PRNGKey(0)
    kx, kp = jax.random.split(key)

    # Deterministic "parameter" init (analog of torch.randn(1, seq_length, H)).
    params = jax.random.normal(kp, (1, seq_length, H), dtype=jnp.float32)
    x = jax.random.normal(kx, (B, S, H), dtype=jnp.float32)

    out = learnable_pos_encoding(x, params)
    out = jax.block_until_ready(out)

    # Reference check in plain JAX.
    ref = x + params[:, :S, :]
    assert out.shape == (B, S, H)
    assert jnp.allclose(out, ref, atol=1e-6), "mismatch vs reference"

    print("KERNEL_OK")
</pallas_src>

<mosaic_0001>
module attributes {stable_mosaic.version = 11 : i64} {
  func.func @_pos_add_kernel(%arg0: i32, %arg1: i32, %arg2: memref<2x256xf32, #tpu.memory_space<vmem>>, %arg3: memref<1x256xf32, #tpu.memory_space<vmem>>, %arg4: memref<2x256xf32, #tpu.memory_space<vmem>>) attributes {dimension_semantics = [#tpu.dimension_semantics<parallel>, #tpu.dimension_semantics<parallel>], iteration_bounds = array<i64: 1, 1>, scalar_prefetch = 0 : i64, scratch_operands = 0 : i64, tpu.core_type = #tpu.core_type<tc>, window_params = [{transform_indices = @transform_0, window_bounds = array<i64: 2, 256>}, {transform_indices = @transform_1, window_bounds = array<i64: 1, 256>}, {transform_indices = @transform_2, window_bounds = array<i64: 2, 256>}]} {
    %c0 = arith.constant 0 : index
    %c0_0 = arith.constant 0 : index
    %0 = vector.load %arg2[%c0, %c0_0] : memref<2x256xf32, #tpu.memory_space<vmem>>, vector<2x256xf32>
    %c0_1 = arith.constant 0 : index
    %c0_2 = arith.constant 0 : index
    %1 = vector.load %arg3[%c0_1, %c0_2] : memref<1x256xf32, #tpu.memory_space<vmem>>, vector<1x256xf32>
    %2 = vector.broadcast %1 : vector<1x256xf32> to vector<2x256xf32>
    %3 = arith.addf %0, %2 : vector<2x256xf32>
    %c0_3 = arith.constant 0 : index
    %c0_4 = arith.constant 0 : index
    %4 = vector.load %arg4[%c0_3, %c0_4] : memref<2x256xf32, #tpu.memory_space<vmem>>, vector<2x256xf32>
    tpu.vector_store %arg4[%c0_3, %c0_4], %3 {strides = array<i32>} : memref<2x256xf32, #tpu.memory_space<vmem>>, vector<2x256xf32>,
    return
  }
  func.func @transform_0(%arg0: i32, %arg1: i32) -> (i32, i32) {
    %c0_i32 = arith.constant 0 : i32
    return %arg1, %arg0 : i32, i32
  }
  func.func @transform_1(%arg0: i32, %arg1: i32) -> (i32, i32) {
    %c0_i32 = arith.constant 0 : i32
    %c0_i32_0 = arith.constant 0 : i32
    return %c0_i32, %arg0 : i32, i32
  }
  func.func @transform_2(%arg0: i32, %arg1: i32) -> (i32, i32) {
    %c0_i32 = arith.constant 0 : i32
    return %arg1, %arg0 : i32, i32
  }
}

</mosaic_0001>

<bundles_post_ra>
// kernel: learnable_pos_encoding.1
= control target key start
LH: loop header
LB: loop body
LE: loop exit
PB: predicated region body
PF: predicated region fallthrough
CT: control target
= control target key end

     0   :  { %v14_v0 = vlaneseq  ;;  %v38_v1 = vmov 1983009808   ;;  %s63_s1 = inlined_call_operand.vmem [shape: f32[1,256], index: 1, kind: input, shape index: {}]   ;;  %s64_s0 = inlined_call_operand.vmem [shape: f32[2,256], index: 0, kind: input, shape index: {}]   ;;  %s65_s2 = inlined_call_operand.vmem [shape: f32[2,256], index: 2, kind: output, shape index: {}]  }
   0x1   :  { %v24_v2 = vunpack.c.l.s4 %v38_v1  ;;  %v12_v4 = vld [vmem:[%s63_s1] sm:$0x3] }
   0x2   :  { %v15_v3 = vshrl.u32 %v14_v0, 7  ;;  %v11_v12 = vld [vmem:[%s64_s0] sm:$0xf] }
   0x3   :  { %v25_v5 = vunpack.c.0.s8 %v24_v2 }
   0x4   :  { %v16_v6 = vsub.s32 0, %v15_v3  ;;  %v20_v7 = vsub.s32 1, %v15_v3 }
   0x5   :  { %v28_v10 = vsub.s32 %v25_v5, %v15_v3 }
   0x6   :  { %v17_v8 = vrot.slane %v12_v4, %v16_v6  ;;  %v21_v9 = vrot.slane %v12_v4, %v20_v7 }
   0x8   :  { %v22_v11 = vcombine.low %v17_v8, %v21_v9 }
   0xa   :  { %v29_v13 = vrot.slane %v22_v11, %v28_v10 }
   0xc   :  { %v31_v14 = vadd.f32 %v29_v13, %v11_v12 }
   0xe   :  { %32 = vst [vmem:[%s65_s2] sm:$0xf] %v31_v14 }

</bundles_post_ra>
